<compile_context>
chip_gen: v7x
topology: tpu7x:2x2x1
jax: 0.10.0
libtpu: 0.0.40
codegen_flags: <defaults>
</compile_context>

<pallas_src>
import jax
import jax.numpy as jnp
from jax import lax
from jax.experimental import pallas as pl
from jax.experimental.pallas import tpu as pltpu


def _round_up(x: int, m: int) -> int:
    return ((x + m - 1) // m) * m


def _vmem_bytes_estimate(tile_b: int, x_itemsize: int, hidden: int) -> int:
    """Rough per-core VMEM footprint for the chosen batch tile."""
    lanes = 128                                   # D=32 lane-pads to 128 in VMEM (~4x)
    x_buf = 2 * tile_b * lanes * x_itemsize       # double-buffered streamed x tile
    h_tmp = 3 * tile_b * hidden * 4               # h_t f32 + elementwise temps (headroom)
    o_buf = 2 * tile_b * 4                        # double-buffered lane-dense output row
    params = 8 * hidden * lanes * 4               # resident w1/b1/w2 (+ slack)
    return x_buf + h_tmp + o_buf + params


def mlp_kernel(x_ref, w1_ref, b1_ref, w2_ref, b2_ref, o_ref):
    # fc1, transposed so the batch lives on the lane axis:
    #   h_t[H, TILE_B] = W1[H, D] . x[TILE_B, D]^T   (contract on D, f32 accumulation)
    # This is the same rhs-lane-contraction the flash-attention q@k^T pattern uses;
    # it keeps the output lane-dense without relayouting the logit.
    x = x_ref[...]                      # (TILE_B, D)
    w1 = w1_ref[...]                    # (H, D)  -- PyTorch fc1.weight layout
    h_t = lax.dot_general(
        w1, x,
        dimension_numbers=(((1,), (1,)), ((), ())),
        preferred_element_type=jnp.float32,
    )                                   # (H, TILE_B), float32

    # bias + ReLU on the VPU (f32)
    h_t = jnp.maximum(h_t + b1_ref[...], 0.0)

    # Dropout(p=0.3) is identity in eval/inference mode.
    # TODO(synk): training-mode dropout (scaled Bernoulli mask via pltpu.prng_*) not emitted.

    # fc2 as VPU multiply + sublane reduction (avoids a wasteful [*,H]@[H,1] MXU op):
    #   logit[1, TILE_B] = sum_H(h_t * w2) + b2
    logit = jnp.sum(h_t * w2_ref[...], axis=0, keepdims=True) + b2_ref[0, 0]

    # Exact sigmoid: exp on the EUP, exact EUP reciprocal (approx flips near-0.5 cases).
    o_ref[...] = pl.reciprocal(1.0 + jnp.exp(-logit), approx=False)


def ai_content_classifier(x, w1, b1, w2, b2, *, tile_b: int | None = None):
    """Fused forward pass.

    x : [B, D]  (float32 or bfloat16 — accumulation stays f32)
    w1: [H, D]  (PyTorch fc1.weight layout)
    b1: [H]
    w2: [1, H]  (PyTorch fc2.weight layout)
    b2: [1]
    returns [B, 1] float32 probabilities.
    """
    B, D = x.shape
    H, D2 = w1.shape
    assert D2 == D and b1.shape == (H,) and w2.shape == (1, H) and b2.shape == (1,)

    # --- Batch tile selection -------------------------------------------------
    # Large enough that the per-step x DMA dwarfs the ~0.35 us grid-step overhead,
    # small enough that double-buffered x + f32 temps fit v7x's 64 MiB VMEM.
    if tile_b is None:
        tile_b = 16384 if x.dtype == jnp.bfloat16 else 8192
    tile_b = max(128, _round_up(min(tile_b, _round_up(B, 128)), 128))
    vmem_cap = 48 << 20  # leave headroom under v7x's 64 MiB physical VMEM
    while tile_b > 128 and _vmem_bytes_estimate(tile_b, x.dtype.itemsize, H) > vmem_cap:
        tile_b = _round_up(tile_b // 2, 128)
    vmem_limit = min(
        max(_vmem_bytes_estimate(tile_b, x.dtype.itemsize, H) + (8 << 20), 32 << 20),
        56 << 20,
    )

    # No jnp.pad of x: Pallas handles the partial last block; garbage tail rows are
    # row-independent and the output is sliced to [:B].
    grid = (pl.cdiv(B, tile_b),)

    # Parameters in kernel layout; elementwise params stay f32 on every chip.
    w1c = w1.astype(x.dtype)                       # matmul operand dtype follows x
    b1c = b1.reshape(H, 1).astype(jnp.float32)
    w2c = w2.reshape(H, 1).astype(jnp.float32)
    b2c = b2.reshape(1, 1).astype(jnp.float32)

    out_row = pl.pallas_call(
        mlp_kernel,
        out_shape=jax.ShapeDtypeStruct((1, B), jnp.float32),
        grid=grid,
        in_specs=[
            # x: the only large HBM stream, double-buffered over the batch grid.
            # (If the profile still shows exposed DMA, pipeline_mode=pl.Buffered(3)
            # on this spec is the next knob.)
            pl.BlockSpec((tile_b, D), lambda i: (i, 0)),
            pl.BlockSpec((H, D), lambda i: (0, 0)),             # w1: VMEM-resident
            pl.BlockSpec((H, 1), lambda i: (0, 0)),             # b1: VMEM-resident
            pl.BlockSpec((H, 1), lambda i: (0, 0)),             # w2: VMEM-resident
            pl.BlockSpec(memory_space=pltpu.MemorySpace.SMEM),  # b2: SMEM scalar
        ],
        out_specs=pl.BlockSpec((1, tile_b), lambda i: (0, i)),  # lane-dense output row
        compiler_params=pltpu.CompilerParams(
            dimension_semantics=("parallel",),   # batch tiles independent across TCs
            vmem_limit_bytes=vmem_limit,
        ),
    )(x, w1c, b1c, w2c, b2c)

    return out_row[0, :].reshape(B, 1)


if __name__ == "__main__":
    # Small shapes consistent with the module: input_dim=32, hidden_dim=128, batch=8.
    B, D, H = 8, 32, 128

    key = jax.random.PRNGKey(0)
    kx, kw1, kb1, kw2, kb2 = jax.random.split(key, 5)

    # Deterministic synthetic parameters in PyTorch layouts (nn.Linear-ish init scale).
    x = jax.random.normal(kx, (B, D), dtype=jnp.float32)
    bound1 = 1.0 / (D ** 0.5)
    w1 = jax.random.uniform(kw1, (H, D), minval=-bound1, maxval=bound1, dtype=jnp.float32)
    b1 = jax.random.uniform(kb1, (H,), minval=-bound1, maxval=bound1, dtype=jnp.float32)
    bound2 = 1.0 / (H ** 0.5)
    w2 = jax.random.uniform(kw2, (1, H), minval=-bound2, maxval=bound2, dtype=jnp.float32)
    b2 = jax.random.uniform(kb2, (1,), minval=-bound2, maxval=bound2, dtype=jnp.float32)

    out = ai_content_classifier(x, w1, b1, w2, b2)
    out = jax.block_until_ready(out)

    # Pure-JAX reference (dropout is identity in eval mode).
    ref = jax.nn.sigmoid(jnp.maximum(x @ w1.T + b1, 0.0) @ w2.T + b2)
    assert out.shape == (B, 1)
    assert bool(jnp.all(jnp.isfinite(out)))
    # Tolerance covers TPU default-precision matmul differences between the kernel
    # and the XLA reference; sigmoid itself is now exact.
    assert jnp.allclose(out, ref, atol=2e-3, rtol=1e-3), (out, ref)

    print("KERNEL_OK")
</pallas_src>

<mosaic_0001>
module attributes {stable_mosaic.version = 11 : i64} {
  func.func @mlp_kernel(%arg0: i32, %arg1: memref<128x32xf32, #tpu.memory_space<vmem>>, %arg2: memref<128x32xf32, #tpu.memory_space<vmem>>, %arg3: memref<128x1xf32, #tpu.memory_space<vmem>>, %arg4: memref<128x1xf32, #tpu.memory_space<vmem>>, %arg5: memref<1x1xf32, #tpu.memory_space<smem>>, %arg6: memref<1x128xf32, #tpu.memory_space<vmem>>) attributes {dimension_semantics = [#tpu.dimension_semantics<parallel>], iteration_bounds = array<i64: 1>, scalar_prefetch = 0 : i64, scratch_operands = 0 : i64, tpu.core_type = #tpu.core_type<tc>, window_params = [{transform_indices = @transform_0, window_bounds = array<i64: 128, 32>}, {pipeline_mode = #tpu.pipeline_mode<synchronous>, transform_indices = @transform_1, window_bounds = array<i64: 128, 32>}, {pipeline_mode = #tpu.pipeline_mode<synchronous>, transform_indices = @transform_2, window_bounds = array<i64: 128, 1>}, {pipeline_mode = #tpu.pipeline_mode<synchronous>, transform_indices = @transform_3, window_bounds = array<i64: 128, 1>}, {transform_indices = @transform_4, window_bounds = array<i64: 1, 1>}, {transform_indices = @transform_5, window_bounds = array<i64: 1, 128>}]} {
    %c0 = arith.constant 0 : index
    %c0_0 = arith.constant 0 : index
    %0 = vector.load %arg1[%c0, %c0_0] : memref<128x32xf32, #tpu.memory_space<vmem>>, vector<128x32xf32>
    %c0_1 = arith.constant 0 : index
    %c0_2 = arith.constant 0 : index
    %1 = vector.load %arg2[%c0_1, %c0_2] : memref<128x32xf32, #tpu.memory_space<vmem>>, vector<128x32xf32>
    %cst = arith.constant dense<0.000000e+00> : vector<128x128xf32>
    %2 = tpu.matmul %1, %0, %cst {dimension_numbers = #tpu.dot_dimension_numbers<[1], [1], [0], [0], [0, 0, 1, 0], [], []>} : vector<128x32xf32>, vector<128x32xf32>, vector<128x128xf32> -> vector<128x128xf32>
    %c0_3 = arith.constant 0 : index
    %c0_4 = arith.constant 0 : index
    %3 = vector.load %arg3[%c0_3, %c0_4] : memref<128x1xf32, #tpu.memory_space<vmem>>, vector<128x1xf32>
    %4 = vector.broadcast %3 : vector<128x1xf32> to vector<128x128xf32>
    %5 = arith.addf %2, %4 : vector<128x128xf32>
    %cst_5 = arith.constant 0.000000e+00 : f32
    %6 = vector.broadcast %cst_5 : f32 to vector<128x128xf32>
    %7 = arith.maximumf %5, %6 : vector<128x128xf32>
    %c0_6 = arith.constant 0 : index
    %c0_7 = arith.constant 0 : index
    %8 = vector.load %arg4[%c0_6, %c0_7] : memref<128x1xf32, #tpu.memory_space<vmem>>, vector<128x1xf32>
    %9 = vector.broadcast %8 : vector<128x1xf32> to vector<128x128xf32>
    %10 = arith.mulf %7, %9 : vector<128x128xf32>
    %cst_8 = arith.constant dense<0.000000e+00> : vector<128xf32>
    %11 = vector.multi_reduction <add>, %10, %cst_8 [0] : vector<128x128xf32> to vector<128xf32>
    %12 = vector.shape_cast %11 : vector<128xf32> to vector<1x128xf32>
    %c0_9 = arith.constant 0 : index
    %c0_10 = arith.constant 0 : index
    %13 = memref.load %arg5[%c0_9, %c0_10] : memref<1x1xf32, #tpu.memory_space<smem>>
    %14 = vector.broadcast %13 : f32 to vector<1x128xf32>
    %15 = arith.addf %12, %14 : vector<1x128xf32>
    %cst_11 = arith.constant 0.000000e+00 : f32
    %16 = vector.broadcast %cst_11 : f32 to vector<1x128xf32>
    %17 = arith.subf %16, %15 : vector<1x128xf32>
    %18 = math.exp %17 : vector<1x128xf32>
    %cst_12 = arith.constant 1.000000e+00 : f32
    %19 = vector.broadcast %cst_12 : f32 to vector<1x128xf32>
    %20 = arith.addf %19, %18 : vector<1x128xf32>
    %21 = tpu.reciprocal %20 : vector<1x128xf32> -> vector<1x128xf32>
    %c0_13 = arith.constant 0 : index
    %c0_14 = arith.constant 0 : index
    %22 = vector.load %arg6[%c0_13, %c0_14] : memref<1x128xf32, #tpu.memory_space<vmem>>, vector<1x128xf32>
    tpu.vector_store %arg6[%c0_13, %c0_14], %21 {strides = array<i32>} : memref<1x128xf32, #tpu.memory_space<vmem>>, vector<1x128xf32>,
    return
  }
  func.func @transform_0(%arg0: i32) -> (i32, i32) {
    %c0_i32 = arith.constant 0 : i32
    %c0_i32_0 = arith.constant 0 : i32
    return %arg0, %c0_i32 : i32, i32
  }
  func.func @transform_1(%arg0: i32) -> (i32, i32) {
    %c0_i32 = arith.constant 0 : i32
    %c0_i32_0 = arith.constant 0 : i32
    %c0_i32_1 = arith.constant 0 : i32
    return %c0_i32, %c0_i32_0 : i32, i32
  }
  func.func @transform_2(%arg0: i32) -> (i32, i32) {
    %c0_i32 = arith.constant 0 : i32
    %c0_i32_0 = arith.constant 0 : i32
    %c0_i32_1 = arith.constant 0 : i32
    return %c0_i32, %c0_i32_0 : i32, i32
  }
  func.func @transform_3(%arg0: i32) -> (i32, i32) {
    %c0_i32 = arith.constant 0 : i32
    %c0_i32_0 = arith.constant 0 : i32
    %c0_i32_1 = arith.constant 0 : i32
    return %c0_i32, %c0_i32_0 : i32, i32
  }
  func.func @transform_4(%arg0: i32) -> (i32, i32) {
    %c0_i32 = arith.constant 0 : i32
    %c0_i32_0 = arith.constant 0 : i32
    %c0_i32_1 = arith.constant 0 : i32
    return %c0_i32, %c0_i32_0 : i32, i32
  }
  func.func @transform_5(%arg0: i32) -> (i32, i32) {
    %c0_i32 = arith.constant 0 : i32
    %c0_i32_0 = arith.constant 0 : i32
    return %c0_i32, %arg0 : i32, i32
  }
}

</mosaic_0001>

<bundles_post_ra>
// kernel: tpu_custom_call.1
= control target key start
LH: loop header
LB: loop body
LE: loop exit
PB: predicated region body
PF: predicated region fallthrough
CT: control target
= control target key end

     0   :  { %vm150_vm0 = vcmask 261120   ;;  %v780_v6 = vmov 0   ;;  %s1105_s0 = inlined_call_operand.vmem [shape: f32[8,32], index: 0, kind: input, shape index: {}]   ;;  %s1106_s1 = inlined_call_operand.vmem [shape: f32[128,32], index: 1, kind: input, shape index: {}]   ;;  %s1107_s2 = inlined_call_operand.vmem [shape: f32[128,1], index: 2, kind: input, shape index: {}]   ;;  %s1108_s3 = inlined_call_operand.vmem [shape: f32[128,1], index: 3, kind: input, shape index: {}]   ;;  %s1109_s4 = inlined_call_operand.<no memory space> [shape: f32[1,1], index: 4, kind: input, shape index: {}]   ;;  %s1110_s5 = inlined_call_operand.hbm [shape: f32[1,8], index: 5, kind: output, shape index: {}]  }
   0x1   :  { %v22_v0 = vld [vmem:[%s1105_s0] sm:$0xff]  ;;  %v23_v1 = vld [vmem:[%s1105_s0 + $0x8] sm:$0xff]  ;;  %v24_v2 = vld [vmem:[%s1105_s0 + $0x10] sm:$0xff]  ;;  %750 = vset.pattern.permute.xlu0 %v780_v6  ;;  %751 = vset.pattern.permute.xlu1 %v780_v6 }
   0x2   :  { %v684_v3 = vpack.c.bf16 %v23_v1, %v22_v0  ;;  %vm823_vm1 = vmpackc.low %vm150_vm0, %vm150_vm0  ;;  %v25_v5 = vld [vmem:[%s1105_s0 + $0x18] sm:$0xff]  ;;  %v26_v8 = vld [vmem:[%s1105_s0 + $0x20] sm:$0xff] }
   0x3   :  { %v690_v7 = vpack.c.bf16 %v25_v5, %v24_v2  ;;  %v27_v9 = vld [vmem:[%s1105_s0 + $0x28] sm:$0xff]  ;;  %v54_v10 = vld [vmem:[%s1107_s2] sm:$0xff]  ;;  %v56_v11 = vld [vmem:[%s1107_s2 + $0x10] sm:$0xff] }
   0x4   :  { %686 = vmatprep.subr.msk.bf16.mxu0 %vm823_vm1, %v684_v3  ;;  %732 = vmatprep.subr.msk.bf16.mxu1 %vm823_vm1, %v684_v3  ;;  %v38_v12 = vld [vmem:[%s1106_s1] sm:$0xff]  ;;  %v55_v14 = vld [vmem:[%s1107_s2 + $0x8] sm:$0xff]  ;;  %v57_v15 = vld [vmem:[%s1107_s2 + $0x18] sm:$0xff]  ;;  %v696_v16 = vpack.c.bf16 %v27_v9, %v26_v8 }
   0x5   :  { %689 = vmatpush3.bf16.xpose.msk.msra.mxu0 %vm823_vm1, %v684_v3  ;;  %740 = vmatpush3.bf16.xpose.msk.msra.mxu1 %vm823_vm1, %v684_v3  ;;  %v46_v13 = vld [vmem:[%s1106_s1 + $0x40] sm:$0xff]  ;;  %v409_v18 = vld [vmem:[%s1108_s3 + $0x8] sm:$0xff]  ;;  %v28_v19 = vld [vmem:[%s1105_s0 + $0x30] sm:$0xff] }
   0x6   :  { %692 = vmatprep.subr.msk.bf16.mxu0 %vm823_vm1, %v690_v7  ;;  %733 = vmatprep.subr.msk.bf16.mxu1 %vm823_vm1, %v690_v7  ;;  %v408_v17 = vld [vmem:[%s1108_s3] sm:$0xff]  ;;  %v29_v20 = vld [vmem:[%s1105_s0 + $0x38] sm:$0xff]  ;;  %v410_v22 = vld [vmem:[%s1108_s3 + $0x10] sm:$0xff] }
   0x7   :  { %72 = vperm.xlu0 %750, %v54_v10   ;;  %82 = vperm.xlu1 %751, %v56_v11   ;;  %v58_v21 = vld [vmem:[%s1107_s2 + $0x20] sm:$0xff]  ;;  %v702_v23 = vpack.c.bf16 %v29_v20, %v28_v19  ;;  %v59_v24 = vld [vmem:[%s1107_s2 + $0x28] sm:$0xff]  ;;  %v411_v25 = vld [vmem:[%s1108_s3 + $0x18] sm:$0xff] }
   0x8   :  { %660 = vmatprep.mubr.msk.f32.mxu0 %vm150_vm0, %v38_v12  ;;  %672 = vmatprep.mubr.msk.f32.mxu1 %vm150_vm0, %v46_v13 }
   0xb   :  { %77 = vperm.xlu0 %750, %v55_v14   ;;  %87 = vperm.xlu1 %751, %v57_v15  }
   0xd   :  { %695 = vmatpush3.bf16.xpose.msk.msra.mxu0 %vm823_vm1, %v690_v7  ;;  %741 = vmatpush3.bf16.xpose.msk.msra.mxu1 %vm823_vm1, %v690_v7 }
   0xe   :  { %698 = vmatprep.subr.msk.bf16.mxu0 %vm823_vm1, %v696_v16  ;;  %734 = vmatprep.subr.msk.bf16.mxu1 %vm823_vm1, %v696_v16 }
   0xf   :  { %426 = vperm.xlu0 %750, %v408_v17   ;;  %431 = vperm.xlu1 %751, %v409_v18  }
  0x13   :  { %92 = vperm.xlu0 %750, %v58_v21   ;;  %436 = vperm.xlu1 %751, %v410_v22  }
  0x15   :  { %701 = vmatpush3.bf16.xpose.msk.msra.mxu0 %vm823_vm1, %v696_v16  ;;  %742 = vmatpush3.bf16.xpose.msk.msra.mxu1 %vm823_vm1, %v696_v16 }
  0x16   :  { %704 = vmatprep.subr.msk.bf16.mxu0 %vm823_vm1, %v702_v23  ;;  %735 = vmatprep.subr.msk.bf16.mxu1 %vm823_vm1, %v702_v23 }
  0x17   :  { %11 = vsyncpa [#allocation4], 0  ;;  %v30_v26 = vld [vmem:[%s1105_s0 + $0x40] sm:$0xff]  ;;  %v31_v27 = vld [vmem:[%s1105_s0 + $0x48] sm:$0xff]  ;;  %97 = vperm.xlu0 %750, %v59_v24   ;;  %441 = vperm.xlu1 %751, %v411_v25   ;;  %s781_s17 = smov [#allocation3]  }
  0x18   :  { %v60_v28 = vld [vmem:[%s1107_s2 + $0x30] sm:$0xff]  ;;  %v412_v29 = vld [vmem:[%s1108_s3 + $0x20] sm:$0xff]  ;;  %v708_v30 = vpack.c.bf16 %v31_v27, %v30_v26  ;;  %v61_v31 = vld [vmem:[%s1107_s2 + $0x38] sm:$0xff]  ;;  %s556_s18 = sshll.u32 %s781_s17, 4  ;;  %s557_s18 = int_to_ptr.vmem [resolvable:$true] %s556_s18 }
  0x19   :  { %v413_v32 = vld [vmem:[%s1108_s3 + $0x28] sm:$0xff]  ;;  %v32_v33 = vld [vmem:[%s1105_s0 + $0x50] sm:$0xff]  ;;  %v33_v34 = vld [vmem:[%s1105_s0 + $0x58] sm:$0xff]  ;;  %s756_s19 = scalar_lea.vmem %s557_s18, 16  ;;  %s760_s20 = scalar_lea.vmem %s557_s18, 32 }
  0x1a   :  { %v62_v35 = vld [vmem:[%s1107_s2 + $0x40] sm:$0xff]  ;;  %v414_v36 = vld [vmem:[%s1108_s3 + $0x30] sm:$0xff]  ;;  %v714_v37 = vpack.c.bf16 %v33_v34, %v32_v33  ;;  %v63_v38 = vld [vmem:[%s1107_s2 + $0x48] sm:$0xff]  ;;  %p757_p0 = scmp.ne.s32.totalorder %s557_s18, %s756_s19  ;;  %p761_p1 = scmp.lt.s32.totalorder %s557_s18, %s557_s18 }
  0x1b   :  { %102 = vperm.xlu0 %750, %v60_v28   ;;  %446 = vperm.xlu1 %751, %v412_v29   ;;  %v415_v39 = vld [vmem:[%s1108_s3 + $0x38] sm:$0xff]  ;;  %v34_v40 = vld [vmem:[%s1105_s0 + $0x60] sm:$0xff]  ;;  %v35_v41 = vld [vmem:[%s1105_s0 + $0x68] sm:$0xff]  ;;  %p762_p2 = scmp.lt.s32.totalorder %s760_s20, %s756_s19 }
  0x1c   :  { %v64_v42 = vld [vmem:[%s1107_s2 + $0x50] sm:$0xff]  ;;  %v416_v43 = vld [vmem:[%s1108_s3 + $0x40] sm:$0xff]  ;;  %v720_v44 = vpack.c.bf16 %v35_v41, %v34_v40  ;;  %v65_v45 = vld [vmem:[%s1107_s2 + $0x58] sm:$0xff] }
  0x1d   :  { %707 = vmatpush3.bf16.xpose.msk.msra.mxu0 %vm823_vm1, %v702_v23  ;;  %743 = vmatpush3.bf16.xpose.msk.msra.mxu1 %vm823_vm1, %v702_v23  ;;  %v417_v46 = vld [vmem:[%s1108_s3 + $0x48] sm:$0xff]  ;;  %v36_v47 = vld [vmem:[%s1105_s0 + $0x70] sm:$0xff]  ;;  %v37_v48 = vld [vmem:[%s1105_s0 + $0x78] sm:$0xff]  ;;  %p763_p3 = por %p762_p2, %p761_p1 }
  0x1e   :  { %710 = vmatprep.subr.msk.bf16.mxu0 %vm823_vm1, %v708_v30  ;;  %736 = vmatprep.subr.msk.bf16.mxu1 %vm823_vm1, %v708_v30  ;;  %v66_v49 = vld [vmem:[%s1107_s2 + $0x60] sm:$0xff]  ;;  %v418_v50 = vld [vmem:[%s1108_s3 + $0x50] sm:$0xff]  ;;  %v726_v51 = vpack.c.bf16 %v37_v48, %v36_v47  ;;  %v67_v52 = vld [vmem:[%s1107_s2 + $0x68] sm:$0xff] }
  0x1f   :  { %107 = vperm.xlu0 %750, %v61_v31   ;;  %451 = vperm.xlu1 %751, %v413_v32   ;;  %v419_v53 = vld [vmem:[%s1108_s3 + $0x58] sm:$0xff]  ;;  %v68_v54 = vld [vmem:[%s1107_s2 + $0x70] sm:$0xff]  ;;  %v420_v55 = vld [vmem:[%s1108_s3 + $0x60] sm:$0xff]  ;;  %p764_p4 = pnand %p763_p3, %p757_p0 }
  0x20   :  { %v69_v56 = vld [vmem:[%s1107_s2 + $0x78] sm:$0xff]  ;;  %v421_v57 = vld [vmem:[%s1108_s3 + $0x68] sm:$0xff]  ;;  %v422_v58 = vld [vmem:[%s1108_s3 + $0x70] sm:$0xff] }
  0x21   :  { %v39_v59 = vld [vmem:[%s1106_s1 + $0x8] sm:$0xff]  ;;  %v40_v61 = vld [vmem:[%s1106_s1 + $0x10] sm:$0xff]  ;;  %v423_v63 = vld [vmem:[%s1108_s3 + $0x78] sm:$0xff] }
  0x22   :  { %v47_v60 = vld [vmem:[%s1106_s1 + $0x48] sm:$0xff]  ;;  %v48_v62 = vld [vmem:[%s1106_s1 + $0x50] sm:$0xff]  ;;  %v41_v0 = vld [vmem:[%s1106_s1 + $0x18] sm:$0xff] }
  0x23   :  { %112 = vperm.xlu0 %750, %v62_v35   ;;  %456 = vperm.xlu1 %751, %v414_v36   ;;  %v49_v1 = vld [vmem:[%s1106_s1 + $0x58] sm:$0xff]  ;;  %v42_v2 = vld [vmem:[%s1106_s1 + $0x20] sm:$0xff]  ;;  %v43_v4 = vld [vmem:[%s1106_s1 + $0x28] sm:$0xff] }
  0x24   :  { %v50_v3 = vld [vmem:[%s1106_s1 + $0x60] sm:$0xff]  ;;  %v51_v5 = vld [vmem:[%s1106_s1 + $0x68] sm:$0xff]  ;;  %v44_v6 = vld [vmem:[%s1106_s1 + $0x30] sm:$0xff] }
  0x25   :  { %713 = vmatpush3.bf16.xpose.msk.msra.mxu0 %vm823_vm1, %v708_v30  ;;  %744 = vmatpush3.bf16.xpose.msk.msra.mxu1 %vm823_vm1, %v708_v30  ;;  %v52_v7 = vld [vmem:[%s1106_s1 + $0x70] sm:$0xff]  ;;  %v45_v8 = vld [vmem:[%s1106_s1 + $0x38] sm:$0xff] }
  0x26   :  { %716 = vmatprep.subr.msk.bf16.mxu0 %vm823_vm1, %v714_v37  ;;  %737 = vmatprep.subr.msk.bf16.mxu1 %vm823_vm1, %v714_v37  ;;  %v53_v9 = vld [vmem:[%s1106_s1 + $0x78] sm:$0xff] }
  0x27   :  { %117 = vperm.xlu0 %750, %v63_v38   ;;  %461 = vperm.xlu1 %751, %v415_v39  }
  0x2b   :  { %122 = vperm.xlu0 %750, %v64_v42   ;;  %466 = vperm.xlu1 %751, %v416_v43  }
  0x2d   :  { %719 = vmatpush3.bf16.xpose.msk.msra.mxu0 %vm823_vm1, %v714_v37  ;;  %745 = vmatpush3.bf16.xpose.msk.msra.mxu1 %vm823_vm1, %v714_v37 }
  0x2e   :  { %722 = vmatprep.subr.msk.bf16.mxu0 %vm823_vm1, %v720_v44  ;;  %738 = vmatprep.subr.msk.bf16.mxu1 %vm823_vm1, %v720_v44 }
  0x2f   :  { %127 = vperm.xlu0 %750, %v65_v45   ;;  %471 = vperm.xlu1 %751, %v417_v46  }
  0x33   :  { %132 = vperm.xlu0 %750, %v66_v49   ;;  %476 = vperm.xlu1 %751, %v418_v50  }
  0x35   :  { %725 = vmatpush3.bf16.xpose.msk.msra.mxu0 %vm823_vm1, %v720_v44  ;;  %746 = vmatpush3.bf16.xpose.msk.msra.mxu1 %vm823_vm1, %v720_v44 }
  0x36   :  { %728 = vmatprep.subr.msk.bf16.mxu0 %vm823_vm1, %v726_v51  ;;  %739 = vmatprep.subr.msk.bf16.mxu1 %vm823_vm1, %v726_v51 }
  0x37   :  { %137 = vperm.xlu0 %750, %v67_v52   ;;  %481 = vperm.xlu1 %751, %v419_v53  }
  0x3b   :  { %142 = vperm.xlu0 %750, %v68_v54   ;;  %486 = vperm.xlu1 %751, %v420_v55  }
  0x3d   :  { %731 = vmatpush3.bf16.xpose.msk.msra.mxu0 %vm823_vm1, %v726_v51  ;;  %747 = vmatpush3.bf16.xpose.msk.msra.mxu1 %vm823_vm1, %v726_v51 }
  0x3f   :  { %147 = vperm.xlu0 %750, %v69_v56   ;;  %491 = vperm.xlu1 %751, %v421_v57  }
  0x43   :  { %496 = vperm.xlu0 %750, %v422_v58   ;;  %501 = vperm.xlu1 %751, %v423_v63  }
  0x44   :  { %661 = vmatmul.mubr.msk.f32.vlgmr.msra.gmra.mrb[0].mxu0 %vm150_vm0, %v39_v59  ;;  %673 = vmatmul.mubr.msk.f32.vlgmr.msra.gmra.mrb[0].mxu1 %vm150_vm0, %v47_v60 }
  0x45   :  { %663 = vmatprep.mubr.msk.f32.mxu0 %vm150_vm0, %v40_v61  ;;  %675 = vmatprep.mubr.msk.f32.mxu1 %vm150_vm0, %v48_v62 }
  0x48   :  { %664 = vmatmul.mubr.msk.f32.gmra.mrb[2].mxu0 %vm150_vm0, %v41_v0  ;;  %676 = vmatmul.mubr.msk.f32.gmra.mrb[2].mxu1 %vm150_vm0, %v49_v1 }
  0x49   :  { %666 = vmatprep.mubr.msk.f32.mxu0 %vm150_vm0, %v42_v2  ;;  %678 = vmatprep.mubr.msk.f32.mxu1 %vm150_vm0, %v50_v3 }
  0x4c   :  { %667 = vmatmul.mubr.msk.f32.gmra.mrb[4].mxu0 %vm150_vm0, %v43_v4  ;;  %679 = vmatmul.mubr.msk.f32.gmra.mrb[4].mxu1 %vm150_vm0, %v51_v5 }
  0x4d   :  { %669 = vmatprep.mubr.msk.f32.mxu0 %vm150_vm0, %v44_v6  ;;  %681 = vmatprep.mubr.msk.f32.mxu1 %vm150_vm0, %v52_v7 }
  0x50   :  { %670 = vmatmul.mubr.msk.f32.gmra.mrb[6].mxu0 %vm150_vm0, %v45_v8  ;;  %682 = vmatmul.mubr.msk.f32.gmra.mrb[6].mxu1 %vm150_vm0, %v53_v9 }
  0x86   :  { %v73_v10 = vpop.permute.xlu0 %72  ;;  %v83_v11 = vpop.permute.xlu1 %82 }
  0x8a   :  { %v78_v12 = vpop.permute.xlu0 %77  ;;  %v88_v13 = vpop.permute.xlu1 %87 }
  0x8e   :  { %v427_v14 = vpop.permute.xlu0 %426  ;;  %v432_v15 = vpop.permute.xlu1 %431 }
  0x92   :  { %v93_v16 = vpop.permute.xlu0 %92  ;;  %v437_v17 = vpop.permute.xlu1 %436 }
  0x96   :  { %v98_v18 = vpop.permute.xlu0 %97  ;;  %v442_v19 = vpop.permute.xlu1 %441 }
  0x9a   :  { %v103_v20 = vpop.permute.xlu0 %102  ;;  %v447_v21 = vpop.permute.xlu1 %446 }
  0x9e   :  { %v108_v22 = vpop.permute.xlu0 %107  ;;  %v452_v23 = vpop.permute.xlu1 %451 }
  0xa2   :  { %v113_v24 = vpop.permute.xlu0 %112  ;;  %v457_v25 = vpop.permute.xlu1 %456 }
  0xa6   :  { %v118_v26 = vpop.permute.xlu0 %117  ;;  %v462_v27 = vpop.permute.xlu1 %461 }
  0xaa   :  { %v123_v28 = vpop.permute.xlu0 %122  ;;  %v467_v29 = vpop.permute.xlu1 %466 }
  0xae   :  { %v128_v30 = vpop.permute.xlu0 %127  ;;  %v472_v37 = vpop.permute.xlu1 %471 }
  0xb2   :  { %v133_v48 = vpop.permute.xlu0 %132  ;;  %v477_v59 = vpop.permute.xlu1 %476 }
  0xb6   :  { %v138_v9 = vpop.permute.xlu0 %137 }
 0x117   :  { %v662_v31 = vpop.f32.mrb[0].mxu0  ;;  %v674_v32 = vpop.f32.mrb[0].mxu1 }
 0x118   :  { %v319_v33 = vadd.f32 %v662_v31, %v78_v12  ;;  %v313_v34 = vpop.f32.mrb[1].mxu0  ;;  %v353_v35 = vpop.f32.mrb[1].mxu1 }
 0x119   :  { %v314_v36 = vadd.f32 %v313_v34, %v73_v10  ;;  %v354_v5 = vadd.f32 %v353_v35, %v113_v24  ;;  %v359_v10 = vadd.f32 %v674_v32, %v118_v26 }
 0x11a   :  { %v393_v38 = vmax.f32 %v319_v33, 0.0 }
 0x11b   :  { %v392_v39 = vmax.f32 %v314_v36, 0.0  ;;  %v665_v40 = vpop.f32.mrb[2].mxu0  ;;  %v677_v41 = vpop.f32.mrb[2].mxu1  ;;  %v401_v31 = vmax.f32 %v359_v10, 0.0 }
 0x11c   :  { %v505_v42 = vmul.f32 %v432_v15, %v393_v38  ;;  %v329_v43 = vadd.f32 %v665_v40, %v88_v13  ;;  %v323_v44 = vpop.f32.mrb[3].mxu0  ;;  %v363_v45 = vpop.f32.mrb[3].mxu1  ;;  %v369_v33 = vadd.f32 %v677_v41, %v128_v30 }
 0x11d   :  { %v504_v46 = vmul.f32 %v427_v14, %v392_v39  ;;  %v324_v47 = vadd.f32 %v323_v44, %v83_v11  ;;  %v482_v15 = vpop.permute.xlu1 %481  ;;  %v143_v36 = vpop.permute.xlu0 %142  ;;  %v513_v26 = vmul.f32 %v472_v37, %v401_v31 }
 0x11e   :  { %v395_v50 = vmax.f32 %v329_v43, 0.0 }
 0x11f   :  { %v520_v49 = vadd.f32 %v505_v42, %v504_v46  ;;  %v394_v51 = vmax.f32 %v324_v47, 0.0  ;;  %v668_v52 = vpop.f32.mrb[4].mxu0  ;;  %v680_v53 = vpop.f32.mrb[4].mxu1 }
 0x120   :  { %v339_v54 = vadd.f32 %v668_v52, %v98_v18  ;;  %v333_v55 = vpop.f32.mrb[5].mxu0  ;;  %v373_v56 = vpop.f32.mrb[5].mxu1  ;;  %v507_v60 = vmul.f32 %v442_v19, %v395_v50  ;;  %v379_v32 = vadd.f32 %v680_v53, %v138_v9 }
 0x121   :  { %v506_v57 = vmul.f32 %v437_v17, %v394_v51  ;;  %v334_v58 = vadd.f32 %v333_v55, %v93_v16  ;;  %v400_v16 = vmax.f32 %v354_v5, 0.0  ;;  %v364_v17 = vadd.f32 %v363_v45, %v123_v28  ;;  %v487_v38 = vpop.permute.xlu1 %486 }
 0x122   :  { %v397_v62 = vmax.f32 %v339_v54, 0.0  ;;  %v374_v35 = vadd.f32 %v373_v56, %v133_v48  ;;  %v405_v45 = vmax.f32 %v379_v32, 0.0 }
 0x123   :  { %v521_v61 = vadd.f32 %v520_v49, %v506_v57  ;;  %v396_v63 = vmax.f32 %v334_v58, 0.0  ;;  %v671_v0 = vpop.f32.mrb[6].mxu0  ;;  %v683_v1 = vpop.f32.mrb[6].mxu1  ;;  %v512_v24 = vmul.f32 %v467_v29, %v400_v16 }
 0x124   :  { %v349_v2 = vadd.f32 %v671_v0, %v108_v22  ;;  %v343_v3 = vpop.f32.mrb[7].mxu0  ;;  %v383_v4 = vpop.f32.mrb[7].mxu1  ;;  %v509_v11 = vmul.f32 %v452_v23, %v397_v62  ;;  %v403_v23 = vmax.f32 %v369_v33, 0.0  ;;  %v404_v42 = vmax.f32 %v374_v35, 0.0 }
 0x125   :  { %v508_v6 = vmul.f32 %v447_v21, %v396_v63  ;;  %v522_v7 = vadd.f32 %v521_v61, %v507_v60  ;;  %v344_v8 = vadd.f32 %v343_v3, %v103_v20  ;;  %v402_v21 = vmax.f32 %v364_v17, 0.0  ;;  %v492_v41 = vpop.permute.xlu1 %491 }
 0x126   :  { %v399_v13 = vmax.f32 %v349_v2, 0.0  ;;  %v384_v28 = vadd.f32 %v383_v4, %v143_v36  ;;  %v515_v44 = vmul.f32 %v482_v15, %v403_v23  ;;  %v516_v46 = vmul.f32 %v487_v38, %v404_v42 }
 0x127   :  { %v523_v12 = vadd.f32 %v522_v7, %v508_v6  ;;  %v398_v14 = vmax.f32 %v344_v8, 0.0  ;;  %v514_v40 = vmul.f32 %v477_v59, %v402_v21  ;;  %v517_v48 = vmul.f32 %v492_v41, %v405_v45 }
 0x128   :  { %v511_v22 = vmul.f32 %v462_v27, %v399_v13  ;;  %v406_v29 = vmax.f32 %v384_v28, 0.0  ;;  %v542_v62 = vstv %s1109_s4 }
 0x129   :  { %v510_v18 = vmul.f32 %v457_v25, %v398_v14  ;;  %v524_v19 = vadd.f32 %v523_v12, %v509_v11  ;;  %v148_v25 = vpop.permute.xlu0 %147  ;;  %v502_v53 = vpop.permute.xlu1 %501 }
 0x12a   :  { %v389_v30 = vadd.f32 %v683_v1, %v148_v25 }
 0x12b   :  { %v525_v34 = vadd.f32 %v524_v19, %v510_v18 }
 0x12c   :  { %v407_v49 = vmax.f32 %v389_v30, 0.0 }
 0x12d   :  { %v526_v20 = vadd.f32 %v525_v34, %v511_v22  ;;  %v497_v37 = vpop.permute.xlu0 %496 }
 0x12e   :  { %v518_v51 = vmul.f32 %v497_v37, %v406_v29  ;;  %v519_v54 = vmul.f32 %v502_v53, %v407_v49 }
 0x12f   :  { %v527_v39 = vadd.f32 %v526_v20, %v512_v24 }
 0x131   :  { %v528_v43 = vadd.f32 %v527_v39, %v513_v26 }
 0x133   :  { %v529_v27 = vadd.f32 %v528_v43, %v514_v40 }
 0x135   :  { %v530_v47 = vadd.f32 %v529_v27, %v515_v44 }
 0x137   :  { %v531_v50 = vadd.f32 %v530_v47, %v516_v46 }
 0x139   :  { %v532_v52 = vadd.f32 %v531_v50, %v517_v48 }
 0x13b   :  { %v533_v55 = vadd.f32 %v532_v52, %v518_v51 }
 0x13d   :  { %v534_v56 = vadd.f32 %v533_v55, %v519_v54 }
 0x13f   :  { %v535_v57 = vrot.slane %v534_v56, 4 }
 0x141   :  { %v536_v58 = vadd.f32 %v535_v57, %v534_v56 }
 0x143   :  { %v537_v59 = vrot.slane %v536_v58, 2 }
 0x145   :  { %v538_v60 = vadd.f32 %v537_v59, %v536_v58 }
 0x147   :  { %v539_v61 = vrot.slane %v538_v60, 1 }
 0x149   :  { %v540_v63 = vadd.f32 %v539_v61, %v538_v60 }
 0x14b   :  { %v543_v0 = vadd.f32 %v542_v62, %v540_v63 }
 0x14d   :  { %v544_v1 = vsub.f32 0.0, %v543_v0 }
 0x14f   :  { %v545_v2 = vmul.f32 1.442695, %v544_v1 }
 0x151   :  { %752 = vpow2.f32 %v545_v2 }
 0x15b   :  { %v753_v3 = vpop.eup %752 }
 0x15c   :  { %v547_v4 = vadd.f32 1.0, %v753_v3 }
 0x15e   :  { %754 = vrcp.f32 %v547_v4 }
 0x168   :  { %v755_v5 = vpop.eup %754 }
 0x169   :  { %549 = vst [vmem:[#allocation3] sm:$0x1] %v755_v5 }
 0x16a   :  { %767 = shalt.err (!%p764_p4)
}
 0x16b   :  { %s768_s22 = scalar_lea.hbm %s1110_s5, 16 }
 0x16c   :  { %p769_p5 = scmp.ne.s32.totalorder %s1110_s5, %s768_s22  ;;  %p772_p6 = scmp.lt.u32.totalorder %s768_s22, %s1110_s5 }
 0x16e   :  { %p774_p7 = pnand %p772_p6, %p769_p5 }
 0x170   :  { %777 = shalt.err (!%p774_p7)
}
 0x171   :  { %559 = dma.vmem_to_hbm [thread:$0]  %s557_s18, 16, %s1110_s5, [#allocation4]  }
 0x172   :  { %778 = dma.done.wait [#allocation4], 16  }
 0x173   :  { %779 = vsyncadd [#allocation4], 4294967280 }
 0x174   :  { %563 = vsyncpa [#allocation4], 1 }

</bundles_post_ra>
